<compile_context>
chip_gen: v7x
topology: tpu7x:2x2x1
jax: 0.10.0
libtpu: 0.0.40
codegen_flags: <defaults>
</compile_context>

<pallas_src>
import numpy as np
import jax
import jax.numpy as jnp
from jax.experimental import pallas as pl
from jax.experimental.pallas import tpu as pltpu  # noqa: F401  (used on the scaling path)


# ---------------- fused kernel -----------------------------------------------

def _fused_kernel(xf_ref, x2_ref, wt_ref, b_ref, r_ref, mask_ref, f_ref, o_ref):
    # xf:   (B, N*L)    bf16  flattened input
    # x2:   (B*N, L)    bf16  second view of the same input buffer
    # wt:   (N*L, N*O)  bf16  Linear weight stored (in, out)
    # b:    (1, N*O)    f32   Linear bias
    # r:    (L, B)      bf16  0/1 replication:  R[l, bb]  = (bb == l // rpb)
    # mask: (L, N*O)    f32   0/1 selection:    Mk[l, c]  = (c // M == l % rpb)
    # f:    (N*O, M)    bf16  0/1 fold:         F[c, m]   = (c % M == m)
    # o:    (B*N, M)    f32   output (LeakyReLU applied)

    # ---- stage 1 (MXU): Z = x_flat @ W + bias, f32 accumulate + f32 bias ----
    z = jnp.dot(xf_ref[...], wt_ref[...], preferred_element_type=jnp.float32)
    z = z + b_ref[...]
    z_b = z.astype(jnp.bfloat16)                       # single rounding of Z

    # ---- row-major "reshape" Z (B, N*O) -> Z2 (L, M), done on the MXU -------
    #   Z2 = ((R @ Z) * Mask) @ F      (all constants are 0/1 -> exact fold)
    y = jnp.dot(r_ref[...], z_b, preferred_element_type=jnp.float32)   # (L, N*O)
    ym = (y * mask_ref[...]).astype(jnp.bfloat16)                       # exact
    z2 = jnp.dot(ym, f_ref[...], preferred_element_type=jnp.float32)   # (L, M)
    z2_b = z2.astype(jnp.bfloat16)                                      # exact

    # ---- stage 2 (MXU): out = x2 @ Z2, LeakyReLU(0.001) epilogue ------------
    y2 = jnp.dot(x2_ref[...], z2_b, preferred_element_type=jnp.float32)  # (B*N, M)
    o_ref[...] = jnp.maximum(y2, 0.001 * y2)


# ---------------- wrapper ----------------------------------------------------

def latent_matrix_transformer(x, w_t, b):
    """x: (B, N, L) f32; w_t: (N*L, N*O) f32 (Linear weight transposed, (in,out));
    b: (N*O,) f32.  Returns (B, N, M) f32 with M = B*N*O // L."""
    B, N, L = x.shape
    in_f, out_f = w_t.shape
    assert in_f == N * L

    total = B * out_f
    assert total % L == 0, "B*N*O must be divisible by InLatent_dim L"
    M = total // L
    assert out_f % M == 0, "fold requires L % B == 0 (each Z row -> whole Z2 rows)"
    rpb = out_f // M                      # Z2 rows produced per Z row ( == L // B )

    # One bf16 convert of x; both kernel views are bitcast reshapes of it.
    xb = x.astype(jnp.bfloat16)
    x_flat = xb.reshape(B, in_f)
    x2 = xb.reshape(B * N, L)
    w_b = w_t.astype(jnp.bfloat16)
    b2 = b.reshape(1, out_f).astype(jnp.float32)

    # Constant 0/1 fold matrices (depend only on shapes; exact in bf16).
    li = np.arange(L)
    ci = np.arange(out_f)
    r_np = (li[:, None] // rpb == np.arange(B)[None, :])
    mask_np = (ci[None, :] // M) == (li % rpb)[:, None]
    f_np = (ci[:, None] % M) == np.arange(M)[None, :]
    r_mat = jnp.asarray(r_np.astype(np.float32), dtype=jnp.bfloat16)
    mask = jnp.asarray(mask_np.astype(np.float32), dtype=jnp.float32)
    f_mat = jnp.asarray(f_np.astype(np.float32), dtype=jnp.bfloat16)

    flops = 2 * (B * in_f * out_f            # stage 1
                 + L * B * out_f             # R @ Z
                 + L * out_f * M             # (.) @ F
                 + (B * N) * L * M)          # stage 2
    bytes_accessed = (2 * (x_flat.size + x2.size + w_b.size
                           + r_mat.size + f_mat.size)
                      + 4 * (b2.size + mask.size + B * N * M))

    out = pl.pallas_call(
        _fused_kernel,
        out_shape=jax.ShapeDtypeStruct((B * N, M), jnp.float32),
        in_specs=[
            pl.BlockSpec((B, in_f), lambda: (0, 0)),
            pl.BlockSpec((B * N, L), lambda: (0, 0)),
            pl.BlockSpec((in_f, out_f), lambda: (0, 0)),
            pl.BlockSpec((1, out_f), lambda: (0, 0)),
            pl.BlockSpec((L, B), lambda: (0, 0)),
            pl.BlockSpec((L, out_f), lambda: (0, 0)),
            pl.BlockSpec((out_f, M), lambda: (0, 0)),
        ],
        out_specs=pl.BlockSpec((B * N, M), lambda: (0, 0)),
        cost_estimate=pl.CostEstimate(
            flops=flops, transcendentals=0, bytes_accessed=bytes_accessed),
    )(x_flat, x2, w_b, b2, r_mat, mask, f_mat)

    return out.reshape(B, N, M)            # leading-dim split: free


# ---------------- references for self-check -----------------------------------

def _reference_f32(x, w_t, b):
    """Exact f32 module semantics."""
    B, N, L = x.shape
    hi = jax.lax.Precision.HIGHEST
    z = jnp.dot(x.reshape(B, -1), w_t, precision=hi) + b
    M = (B * z.shape[1]) // L
    z2 = z.reshape(L, M)
    out = jnp.dot(x.reshape(B * N, L), z2, precision=hi).reshape(B, N, M)
    return jnp.maximum(out, 0.001 * out)


def _reference_bf16(x, w_t, b):
    """Precision-matched reference: bf16 inputs, f32 accumulation, Z rounded to
    bf16 before stage 2 (the same roundings the kernel performs)."""
    B, N, L = x.shape
    xb = x.astype(jnp.bfloat16)
    z = jnp.dot(xb.reshape(B, -1), w_t.astype(jnp.bfloat16),
                preferred_element_type=jnp.float32) + b
    M = (B * z.shape[1]) // L
    z2 = z.astype(jnp.bfloat16).reshape(L, M)
    out = jnp.dot(xb.reshape(B * N, L), z2,
                  preferred_element_type=jnp.float32).reshape(B, N, M)
    return jnp.maximum(out, 0.001 * out)


if __name__ == "__main__":
    # Shapes implied by the module: InNode_num N = 8, InLatent_dim L = 16,
    # OutLatentDim O = 16, batch B = 2.
    B, N, L, O = 2, 8, 16, 16
    in_features, out_features = N * L, N * O

    key = jax.random.PRNGKey(0)
    kx, kw, kb = jax.random.split(key, 3)

    x = jax.random.normal(kx, (B, N, L), dtype=jnp.float32)
    # Linear(N*L, N*O) params, weight stored transposed as (in, out).
    w_t = jax.random.normal(kw, (in_features, out_features), dtype=jnp.float32) * 0.02
    b = jax.random.normal(kb, (out_features,), dtype=jnp.float32) * 0.02

    out = jax.block_until_ready(latent_matrix_transformer(x, w_t, b))

    ref_bf = _reference_bf16(x, w_t, b)
    ref_32 = _reference_f32(x, w_t, b)
    assert out.shape == ref_32.shape
    # Tight check against the precision-matched (bf16-in / f32-accumulate) reference.
    assert jnp.allclose(out, ref_bf, atol=1e-2, rtol=1e-2)
    # Loose check against exact f32 module semantics (bf16 input rounding budget).
    assert jnp.allclose(out, ref_32, atol=6e-2, rtol=6e-2)

    print("KERNEL_OK")
</pallas_src>

<mosaic_0001>
module attributes {stable_mosaic.version = 11 : i64} {
  func.func @_fused_kernel(%arg0: memref<2x128xbf16, #tpu.memory_space<vmem>>, %arg1: memref<16x16xbf16, #tpu.memory_space<vmem>>, %arg2: memref<128x128xbf16, #tpu.memory_space<vmem>>, %arg3: memref<1x128xf32, #tpu.memory_space<vmem>>, %arg4: memref<16x2xbf16, #tpu.memory_space<vmem>>, %arg5: memref<16x128xf32, #tpu.memory_space<vmem>>, %arg6: memref<128x16xbf16, #tpu.memory_space<vmem>>, %arg7: memref<16x16xf32, #tpu.memory_space<vmem>>) attributes {dimension_semantics = [], scalar_prefetch = 0 : i64, scratch_operands = 0 : i64, tpu.core_type = #tpu.core_type<tc>} {
    %c0 = arith.constant 0 : index
    %c0_0 = arith.constant 0 : index
    %0 = vector.load %arg0[%c0, %c0_0] : memref<2x128xbf16, #tpu.memory_space<vmem>>, vector<2x128xbf16>
    %c0_1 = arith.constant 0 : index
    %c0_2 = arith.constant 0 : index
    %1 = vector.load %arg2[%c0_1, %c0_2] : memref<128x128xbf16, #tpu.memory_space<vmem>>, vector<128x128xbf16>
    %cst = arith.constant dense<0.000000e+00> : vector<2x128xf32>
    %2 = tpu.matmul %0, %1, %cst {dimension_numbers = #tpu.dot_dimension_numbers<[1], [0], [0], [1], [0, 0, 1, 1], [], []>} : vector<2x128xbf16>, vector<128x128xbf16>, vector<2x128xf32> -> vector<2x128xf32>
    %c0_3 = arith.constant 0 : index
    %c0_4 = arith.constant 0 : index
    %3 = vector.load %arg3[%c0_3, %c0_4] : memref<1x128xf32, #tpu.memory_space<vmem>>, vector<1x128xf32>
    %4 = vector.broadcast %3 : vector<1x128xf32> to vector<2x128xf32>
    %5 = arith.addf %2, %4 : vector<2x128xf32>
    %6 = arith.truncf %5 : vector<2x128xf32> to vector<2x128xbf16>
    %c0_5 = arith.constant 0 : index
    %c0_6 = arith.constant 0 : index
    %7 = vector.load %arg4[%c0_5, %c0_6] : memref<16x2xbf16, #tpu.memory_space<vmem>>, vector<16x2xbf16>
    %cst_7 = arith.constant dense<0.000000e+00> : vector<16x128xf32>
    %8 = tpu.matmul %7, %6, %cst_7 {dimension_numbers = #tpu.dot_dimension_numbers<[1], [0], [0], [1], [0, 0, 1, 1], [], []>} : vector<16x2xbf16>, vector<2x128xbf16>, vector<16x128xf32> -> vector<16x128xf32>
    %c0_8 = arith.constant 0 : index
    %c0_9 = arith.constant 0 : index
    %9 = vector.load %arg5[%c0_8, %c0_9] : memref<16x128xf32, #tpu.memory_space<vmem>>, vector<16x128xf32>
    %10 = arith.mulf %8, %9 : vector<16x128xf32>
    %11 = arith.truncf %10 : vector<16x128xf32> to vector<16x128xbf16>
    %c0_10 = arith.constant 0 : index
    %c0_11 = arith.constant 0 : index
    %12 = vector.load %arg6[%c0_10, %c0_11] : memref<128x16xbf16, #tpu.memory_space<vmem>>, vector<128x16xbf16>
    %cst_12 = arith.constant dense<0.000000e+00> : vector<16x16xf32>
    %13 = tpu.matmul %11, %12, %cst_12 {dimension_numbers = #tpu.dot_dimension_numbers<[1], [0], [0], [1], [0, 0, 1, 1], [], []>} : vector<16x128xbf16>, vector<128x16xbf16>, vector<16x16xf32> -> vector<16x16xf32>
    %14 = arith.truncf %13 : vector<16x16xf32> to vector<16x16xbf16>
    %c0_13 = arith.constant 0 : index
    %c0_14 = arith.constant 0 : index
    %15 = vector.load %arg1[%c0_13, %c0_14] : memref<16x16xbf16, #tpu.memory_space<vmem>>, vector<16x16xbf16>
    %cst_15 = arith.constant dense<0.000000e+00> : vector<16x16xf32>
    %16 = tpu.matmul %15, %14, %cst_15 {dimension_numbers = #tpu.dot_dimension_numbers<[1], [0], [0], [1], [0, 0, 1, 1], [], []>} : vector<16x16xbf16>, vector<16x16xbf16>, vector<16x16xf32> -> vector<16x16xf32>
    %cst_16 = arith.constant 1.000000e-03 : f32
    %17 = vector.broadcast %cst_16 : f32 to vector<16x16xf32>
    %18 = arith.mulf %17, %16 : vector<16x16xf32>
    %19 = arith.maximumf %16, %18 : vector<16x16xf32>
    %c0_17 = arith.constant 0 : index
    %c0_18 = arith.constant 0 : index
    %20 = vector.load %arg7[%c0_17, %c0_18] : memref<16x16xf32, #tpu.memory_space<vmem>>, vector<16x16xf32>
    tpu.vector_store %arg7[%c0_17, %c0_18], %19 {strides = array<i32>} : memref<16x16xf32, #tpu.memory_space<vmem>>, vector<16x16xf32>,
    return
  }
}

</mosaic_0001>

<bundles_post_ra>
// kernel: tpu_custom_call.1
= control target key start
LH: loop header
LB: loop body
LE: loop exit
PB: predicated region body
PF: predicated region fallthrough
CT: control target
= control target key end

     0   :  { %12 = vsyncpa [#allocation3], 0  ;;  %s727_s0 = inlined_call_operand.vmem [shape: bf16[2,128], index: 0, kind: input, shape index: {}]   ;;  %s728_s1 = inlined_call_operand.hbm [shape: bf16[16,16], index: 1, kind: input, shape index: {}]   ;;  %s729_s2 = inlined_call_operand.vmem [shape: bf16[128,128], index: 2, kind: input, shape index: {}]   ;;  %s730_s3 = inlined_call_operand.vmem [shape: f32[1,128], index: 3, kind: input, shape index: {}]   ;;  %s731_s4 = inlined_call_operand.vmem [shape: bf16[16,2], index: 4, kind: input, shape index: {}]   ;;  %s732_s5 = inlined_call_operand.vmem [shape: f32[16,128], index: 5, kind: input, shape index: {}]   ;;  %s733_s6 = inlined_call_operand.vmem [shape: bf16[128,16], index: 6, kind: input, shape index: {}]   ;;  %s734_s7 = inlined_call_operand.hbm [shape: f32[16,16], index: 7, kind: output, shape index: {}]  }
   0x1   :  { %13 = vsyncpa [#allocation4], 0  ;;  %s566_s24 = smov [#allocation2]   ;;  %s518_s28 = scalar_lea.hbm %s728_s1, 128 }
   0x2   :  { %s21_s25 = sshll.u32 %s566_s24, 4  ;;  %p519_p0 = scmp.ne.s32.totalorder %s728_s1, %s518_s28  ;;  %s22_s25 = int_to_ptr.vmem [resolvable:$true] %s21_s25 }
   0x3   :  { %p522_p1 = scmp.lt.u32.totalorder %s518_s28, %s728_s1 }
   0x5   :  { %p524_p2 = pnand %p522_p1, %p519_p0 }
   0x7   :  { %527 = shalt.err (!%p524_p2)
}
   0x8   :  { %s528_s10 = scalar_lea.vmem %s22_s25, 128  ;;  %p533_p4 = scmp.lt.s32.totalorder %s22_s25, %s22_s25 }
   0x9   :  { %p529_p3 = scmp.ne.s32.totalorder %s22_s25, %s528_s10  ;;  %p534_p5 = scmp.lt.s32.totalorder %s528_s10, %s528_s10 }
   0xb   :  { %p535_p6 = por %p534_p5, %p533_p4 }
   0xd   :  { %p536_p7 = pnand %p535_p6, %p529_p3 }
   0xf   :  { %539 = shalt.err (!%p536_p7)
}
  0x10   :  { %s567_s11 = smov 64   ;;  %s568_s12 = smov 4  }
  0x11   :  { %27 = dma.hbm_to_vmem [thread:$0]  %s728_s1, 128, %s22_s25, [#allocation3], %s567_s11, %s567_s11, %s568_s12  }
  0x12   :  { %562 = dma.done.wait [#allocation3], 128  }
  0x13   :  { %563 = vsyncadd [#allocation3], 4294967168  ;;  %v569_v0 = vmov 0.0   ;;  %vm570_vm0 = vmmov 0   ;;  %v500_v1 = vld [vmem:[%s729_s2] sm:$0xff]   ;;  %v501_v2 = vld [vmem:[%s729_s2 + $0x8] sm:$0xff]  }
  0x14   :  { %440 = vmatprep.subr.bf16.mxu0 %v569_v0  ;;  %456 = vmatprep.mubr.msk.bf16.mxu0 %vm570_vm0, %v569_v0  ;;  %v502_v3 = vld [vmem:[%s729_s2 + $0x10] sm:$0xff]   ;;  %v503_v4 = vld [vmem:[%s729_s2 + $0x18] sm:$0xff]   ;;  %v504_v5 = vld [vmem:[%s729_s2 + $0x20] sm:$0xff]   ;;  %vm166_vm1 = vcmask 1040384   ;;  %vm162_vm2 = vcmask 15360   ;;  %vm329_vm3 = vcmask 130048  }
  0x15   :  { %460 = vmatprep.subr.bf16.mxu1 %v569_v0  ;;  %462 = vmatprep.mubr.msk.bf16.mxu1 %vm570_vm0, %v569_v0  ;;  %v505_v6 = vld [vmem:[%s729_s2 + $0x28] sm:$0xff]   ;;  %v506_v7 = vld [vmem:[%s729_s2 + $0x30] sm:$0xff]   ;;  %v507_v8 = vld [vmem:[%s729_s2 + $0x38] sm:$0xff]  }
  0x16   :  { %441 = vmatpush3.bf16.msra.mxu0 %v500_v1  ;;  %v42_v9 = vld [vmem:[%s727_s0] sm:$0x1]  ;;  %v510_v20 = vld [vmem:[%s733_s6 + $0x8] sm:$0xff]   ;;  %v511_v21 = vld [vmem:[%s733_s6 + $0x10] sm:$0xff]  }
  0x17   :  { %442 = vmatprep.subr.bf16.mxu0 %v569_v0  ;;  %v397_v10 = vld [vmem:[%s730_s3] ss:$0 sm:$0xff]  ;;  %v512_v22 = vld [vmem:[%s733_s6 + $0x18] sm:$0xff]   ;;  %v514_v24 = vld [vmem:[%s733_s6 + $0x28] sm:$0xff]  }
  0x18   :  { %v508_v18 = vld [vmem:[%s731_s4] sm:$0xff]   ;;  %v515_v25 = vld [vmem:[%s733_s6 + $0x30] sm:$0xff]   ;;  %v516_v26 = vld [vmem:[%s733_s6 + $0x38] sm:$0xff]  }
  0x19   :  { %v509_v19 = vld [vmem:[%s733_s6] sm:$0xff]   ;;  %v212_v29 = vld [vmem:[%s732_s5 + $0x8] sm:$0xff] }
  0x1a   :  { %443 = vmatpush3.bf16.msra.mxu0 %v501_v2  ;;  %v513_v23 = vld [vmem:[%s733_s6 + $0x20] sm:$0xff]  }
  0x1b   :  { %444 = vmatprep.subr.bf16.mxu0 %v569_v0  ;;  %v211_v28 = vld [vmem:[%s732_s5] sm:$0xff]  ;;  %s571_s5 = smov [#allocation5]  }
  0x1c   :  { %v517_v41 = vld [vmem:[#allocation2] sm:$0xff]   ;;  %s385_s6 = sshll.u32 %s571_s5, 4  ;;  %s386_s6 = int_to_ptr.vmem [resolvable:$true] %s385_s6 }
  0x1d   :  { %s540_s28 = scalar_lea.vmem %s386_s6, 256  ;;  %p545_p9 = scmp.lt.s32.totalorder %s386_s6, %s386_s6 }
  0x1e   :  { %445 = vmatpush3.bf16.msra.mxu0 %v502_v3  ;;  %p541_p8 = scmp.ne.s32.totalorder %s386_s6, %s540_s28  ;;  %p546_p10 = scmp.lt.s32.totalorder %s540_s28, %s540_s28 }
  0x1f   :  { %446 = vmatprep.subr.bf16.mxu0 %v569_v0 }
  0x20   :  { %p547_p11 = por %p546_p10, %p545_p9 }
  0x22   :  { %447 = vmatpush3.bf16.msra.mxu0 %v503_v4  ;;  %p548_p12 = pnand %p547_p11, %p541_p8 }
  0x23   :  { %448 = vmatprep.subr.bf16.mxu0 %v569_v0 }
  0x26   :  { %449 = vmatpush3.bf16.msra.mxu0 %v504_v5 }
  0x27   :  { %450 = vmatprep.subr.bf16.mxu0 %v569_v0 }
  0x2a   :  { %451 = vmatpush3.bf16.msra.mxu0 %v505_v6 }
  0x2b   :  { %452 = vmatprep.subr.bf16.mxu0 %v569_v0 }
  0x2e   :  { %453 = vmatpush3.bf16.msra.mxu0 %v506_v7 }
  0x2f   :  { %454 = vmatprep.subr.bf16.mxu0 %v569_v0 }
  0x32   :  { %455 = vmatpush3.bf16.msra.mxu0 %v507_v8 }
  0x33   :  { %486 = vmatprep.subr.bf16.mxu0 %v569_v0 }
  0x35   :  { %457 = vmatmul.mubr.bf16.vlgmr.msra.gmra.mrb[0].mxu0 %v42_v9 }
  0x36   :  { %488 = vmatprep.mubr.msk.bf16.mxu0 %vm570_vm0, %v569_v0 }
 0x108   :  { %v148_v11 = vpop.f32.mrb[0].mxu0 }
 0x109   :  { %v149_v12 = vadd.f32 %v397_v10, %v148_v11  ;;  %v458_v13 = vpop.f32.mrb[1].mxu0 }
 0x10a   :  { %v151_v14 = vpop.f32.mrb[2].mxu0 }
 0x10b   :  { %v154_v15 = vpack.c.bf16 %v149_v12, %v149_v12  ;;  %v459_v16 = vpop.f32.mrb[3].mxu0 }
 0x10d   :  { %v168_v17 = vsel %vm166_vm1, %v154_v15, 0 }
 0x10e   :  { %461 = vmatpush3.bf16.msra.mxu1 %v168_v17 }
 0x10f   :  { %466 = vmatprep.subr.bf16.mxu1 %v569_v0 }
 0x111   :  { %463 = vmatmul.mubr.msk.bf16.vlgmr.msra.gmra.mrb[0].mxu1 %vm162_vm2, %v508_v18 }
 0x112   :  { %467 = vmatpush3.bf16.msra.mxu1 %v509_v19  ;;  %482 = vmatprep.mubr.msk.bf16.mxu1 %vm570_vm0, %v569_v0 }
 0x113   :  { %468 = vmatprep.subr.bf16.mxu1 %v569_v0 }
 0x116   :  { %469 = vmatpush3.bf16.msra.mxu1 %v510_v20 }
 0x117   :  { %470 = vmatprep.subr.bf16.mxu1 %v569_v0 }
 0x11a   :  { %471 = vmatpush3.bf16.msra.mxu1 %v511_v21 }
 0x11b   :  { %472 = vmatprep.subr.bf16.mxu1 %v569_v0 }
 0x11e   :  { %473 = vmatpush3.bf16.msra.mxu1 %v512_v22 }
 0x11f   :  { %474 = vmatprep.subr.bf16.mxu1 %v569_v0 }
 0x122   :  { %475 = vmatpush3.bf16.msra.mxu1 %v513_v23 }
 0x123   :  { %476 = vmatprep.subr.bf16.mxu1 %v569_v0 }
 0x126   :  { %477 = vmatpush3.bf16.msra.mxu1 %v514_v24 }
 0x127   :  { %478 = vmatprep.subr.bf16.mxu1 %v569_v0 }
 0x12a   :  { %479 = vmatpush3.bf16.msra.mxu1 %v515_v25 }
 0x12b   :  { %480 = vmatprep.subr.bf16.mxu1 %v569_v0 }
 0x12e   :  { %481 = vmatpush3.bf16.msra.mxu1 %v516_v26 }
 0x1e4   :  { %v204_v27 = vpop.f32.mrb[0].mxu1 }
 0x1e5   :  { %v464_v30 = vpop.f32.mrb[1].mxu1  ;;  %v213_v32 = vmul.f32 %v211_v28, %v204_v27 }
 0x1e6   :  { %v207_v31 = vpop.f32.mrb[2].mxu1 }
 0x1e7   :  { %v214_v33 = vmul.f32 %v212_v29, %v207_v31  ;;  %v465_v34 = vpop.f32.mrb[3].mxu1 }
 0x1e9   :  { %v215_v35 = vpack.c.bf16 %v214_v33, %v213_v32 }
 0x1eb   :  { %483 = vmatmul.mubr.bf16.vlgmr.msra.gmra.mrb[4].mxu1 %v215_v35 }
 0x2be   :  { %v314_v36 = vpop.f32.mrb[4].mxu1 }
 0x2bf   :  { %v484_v37 = vpop.f32.mrb[5].mxu1 }
 0x2c0   :  { %v317_v38 = vpop.f32.mrb[6].mxu1 }
 0x2c1   :  { %v321_v39 = vpack.c.bf16 %v317_v38, %v314_v36  ;;  %v485_v40 = vpop.f32.mrb[7].mxu1 }
 0x2c3   :  { %487 = vmatpush3.bf16.msra.mxu0 %v321_v39 }
 0x2c6   :  { %489 = vmatmul.mubr.msk.bf16.vlgmr.msra.gmra.mrb[4].mxu0 %vm329_vm3, %v517_v41 }
 0x399   :  { %v367_v42 = vpop.f32.mrb[4].mxu0 }
 0x39a   :  { %v374_v43 = vmul.f32 0.001, %v367_v42  ;;  %v490_v44 = vpop.f32.mrb[5].mxu0 }
 0x39b   :  { %v370_v45 = vpop.f32.mrb[6].mxu0 }
 0x39c   :  { %v376_v46 = vmax.f32 %v367_v42, %v374_v43  ;;  %v375_v47 = vmul.f32 0.001, %v370_v45  ;;  %v491_v48 = vpop.f32.mrb[7].mxu0 }
 0x39e   :  { %378 = vst.msk [vmem:[#allocation5] sm:$0xff] %vm329_vm3, %v376_v46  ;;  %v377_v49 = vmax.f32 %v370_v45, %v375_v47 }
 0x3a0   :  { %379 = vst.msk [vmem:[#allocation5 + $0x8] sm:$0xff] %vm329_vm3, %v377_v49 }
 0x3a1   :  { %551 = shalt.err (!%p548_p12)
}
 0x3a2   :  { %s552_s8 = scalar_lea.hbm %s734_s7, 256 }
 0x3a3   :  { %p553_p13 = scmp.ne.s32.totalorder %s734_s7, %s552_s8  ;;  %p556_p0 = scmp.lt.u32.totalorder %s552_s8, %s734_s7 }
 0x3a5   :  { %p558_p1 = pnand %p556_p0, %p553_p13 }
 0x3a7   :  { %561 = shalt.err (!%p558_p1)
}
 0x3a8   :  { %s572_s11 = smov 128   ;;  %s573_s12 = smov 8  }
 0x3a9   :  { %391 = dma.vmem_to_hbm [thread:$0]  %s386_s6, 256, %s734_s7, [#allocation4], %s572_s11, %s572_s11, %s573_s12  }
 0x3aa   :  { %564 = dma.done.wait [#allocation4], 256  }
 0x3ab   :  { %565 = vsyncadd [#allocation4], 4294967040 }
 0x3ac   :  { %395 = vsyncpa [#allocation3], 1 }
 0x3ad   :  { %396 = vsyncpa [#allocation4], 1 }

</bundles_post_ra>
